<compile_context>
chip_gen: v7x
topology: tpu7x:2x2x1
jax: 0.10.0
libtpu: 0.0.40
codegen_flags: <defaults>
</compile_context>

<pallas_src>
import functools
import re
from typing import List

import jax
import jax.numpy as jnp
from jax.experimental import pallas as pl
from jax.experimental.pallas import tpu as pltpu

corpus = ['Computer science drives innovation through efficient algorithms and programming languages.', 'Civil engineering designs safe and sustainable structures for modern cities.', 'Software development in computer science supports automated systems in civil engineering projects.', 'Computer algorithms optimize construction schedules and resource allocation in civil engineering.', 'Data analysis in computer science helps predict infrastructure performance and safety.', 'Civil engineers use advanced software to model stress and load on bridges.', 'Computer science innovations lead to better simulation tools for civil engineering design.', 'Robust algorithms ensure reliability in both software systems and civil infrastructure monitoring.', 'Computer science supports the development of smart sensors for monitoring structural health.', 'Civil engineering integrates modern materials with technology to build resilient structures.', 'Advanced computing models simulate earthquake impacts on civil infrastructure.', 'Computer science techniques enhance the design and analysis of civil structures.', 'Civil engineering projects benefit from data analytics and machine learning algorithms.', 'Simulation software developed in computer science aids in stress testing bridges.', 'Computer programming skills are essential for modern civil engineering research.', 'Civil engineering uses geographic information systems powered by computer algorithms.', 'Big data in computer science improves decision-making in large-scale construction projects.', 'Civil engineers rely on software simulations to predict traffic flow and bridge behavior.', 'Machine learning in computer science analyzes structural data from sensors in buildings.', 'Civil engineering designs are enhanced by computer-aided drafting and modeling software.', 'Computer networks enable real-time monitoring of civil infrastructure and urban systems.', 'Civil engineering relies on statistical models developed through computer science to ensure safety.', 'Algorithm development in computer science speeds up simulation processes in civil engineering tasks.', 'Civil engineering and computer science collaborate to create innovative, sustainable urban solutions.', 'Data visualization tools from computer science help civil engineers understand project progress.', 'Computer simulations predict soil behavior and stress distribution in civil construction projects.', 'Civil engineering standards are updated using insights from computer-based data analysis.', 'Computer science improves infrastructure planning with high-speed data processing and smart algorithms.', 'Civil engineers integrate sensors and computer systems to monitor bridge health continuously.', 'Artificial intelligence in computer science enhances the efficiency of civil engineering designs.', 'Civil engineering projects benefit from computer-aided structural analysis and real-time monitoring systems.', 'Computer science methodologies simplify complex calculations for civil engineering load assessments.', 'Civil engineers use digital models created by computer science to simulate water flow in dams.', 'Computer programming enables the automation of monitoring systems in large civil engineering projects.', 'Civil engineering relies on simulation software from computer science for earthquake and flood analysis.', 'Computer science research drives innovations that improve the materials used in civil engineering construction.', 'Civil engineering designs incorporate computational tools from computer science for precise planning.', 'Machine learning models in computer science predict the longevity of civil infrastructure components.', 'Civil engineering safety measures improve with computer-driven data analysis and predictive modeling.', 'Computer science contributes to civil engineering by optimizing construction management and workflow scheduling.', 'Civil engineers design energy-efficient buildings with assistance from computer simulation and thermal analysis.', 'Computer science tools automate routine tasks, freeing civil engineers to focus on innovative design challenges.', 'Civil engineering uses digital mapping and computer-aided design to create detailed construction blueprints.', 'Computer vision algorithms help analyze structural images and detect issues in civil engineering projects.', 'Civil engineers depend on reliable software developed through computer science for design and project management.', 'Computer science innovations enhance virtual reality training for civil engineering workers on construction sites.', 'Civil engineering challenges are solved using computer algorithms that optimize design parameters and improve efficiency.', 'Computer science principles support the development of smart cities with efficient civil engineering infrastructures.', 'Civil engineering integrates environmental analysis and computer models to design sustainable urban areas.', 'Computer science and civil engineering together innovate, creating advanced solutions for construction, sustainability, and urban development.']


def tokenize(document: str) -> List[str]:
    return re.findall(r'\w+', document.lower())


def extract_vocabulary(corpus: List[str]) -> List[str]:
    vocabulary = [token for document in corpus for token in tokenize(document)]
    return sorted(list(set(vocabulary)))


vocabulary = extract_vocabulary(corpus)
VOCAB = len(vocabulary)
OUT_DIM = 10
LANE = 128


def _round_up(x: int, m: int) -> int:
    return ((x + m - 1) // m) * m


def _num_tensorcores_per_chip() -> int:
    """Best-effort TC count per chip (v7x has 2); falls back to 1."""
    try:
        dev = jax.devices()[0]
        n = getattr(dev, "num_cores", None)
        if isinstance(n, int) and n > 0:
            return n
    except Exception:
        pass
    return 1


_NUM_TC = _num_tensorcores_per_chip()


def _default_tb(batch: int) -> int:
    """Per-generation batch tile: one big step on a single TC, 256-row tiles
    (>=1 per core) when two TensorCores are available."""
    b8 = _round_up(max(batch, 1), 8)
    if _NUM_TC >= 2 and b8 >= 2 * 256:
        return 256                      # v7x: one 256-row MXU-filling tile per core
    return min(b8, 512)                 # v5e/v6e: minimize grid steps


# ---------------- Pallas kernel: one batch tile of (x @ W + b) ----------------
def linear_kernel(x_ref, w_ref, b_ref, o_ref):
    # x_ref: (TB, V)    f32  -- streamed per grid step; cast to bf16 in-kernel
    #                           (x is a 0/1 multi-hot, so the cast is exact)
    # w_ref: (V, O_pad) bf16 -- resident (same block every step)
    # b_ref: (1, O_pad) f32  -- resident
    # o_ref: (TB, O_pad) f32 -- lane-dense output tile (unmasked vst)
    x_bf = x_ref[...].astype(jnp.bfloat16)
    o_ref[...] = (
        jnp.dot(x_bf, w_ref[...], preferred_element_type=jnp.float32)
        + b_ref[...]
    )


def prepare_params(w, b):
    """Pad/cast nn.Linear parameters ONCE (hoisted out of the forward path).

    w: (V, 10) f32 (already transposed vs. torch's (10, V) weight)
    b: (10,)   f32
    Returns (w_padded bf16 (V, 128), b_padded f32 (1, 128)).
    """
    V, O = w.shape
    O_pad = _round_up(O, LANE)
    w_p = jnp.zeros((V, O_pad), jnp.bfloat16).at[:, :O].set(w.astype(jnp.bfloat16))
    b_p = jnp.zeros((1, O_pad), jnp.float32).at[0, :O].set(b.astype(jnp.float32))
    return w_p, b_p


@functools.partial(jax.jit, static_argnames=("out_dim", "tb"))
def embedding_layer_forward(x, w_padded, b_padded, *, out_dim=OUT_DIM, tb=None):
    """x: (B, V) f32 multi-hot -> (B, out_dim) f32 == x @ W + b."""
    B, V = x.shape
    Vw, O_pad = w_padded.shape
    assert V == Vw and b_padded.shape == (1, O_pad)

    if tb is None:
        tb = _default_tb(B)
    TB = min(tb, _round_up(B, 8))       # block sublane dim must be a multiple of 8
    B_pad = _round_up(B, TB)

    # Only the batch axis may need padding (to a multiple of TB); fuses under jit.
    x_in = x if B_pad == B else jnp.zeros((B_pad, V), x.dtype).at[:B, :].set(x)

    out_padded = pl.pallas_call(
        linear_kernel,
        out_shape=jax.ShapeDtypeStruct((B_pad, O_pad), jnp.float32),
        grid_spec=pl.GridSpec(
            grid=(B_pad // TB,),
            in_specs=[
                # x: tiled on batch; last dim is the FULL vocab dim (legal:
                # block dim == full array dim), so no vocab padding of x.
                pl.BlockSpec((TB, V), lambda i: (i, 0)),
                # W: resident, full-dim block (V, 128).
                pl.BlockSpec((Vw, O_pad), lambda i: (0, 0)),
                # b: resident.
                pl.BlockSpec((1, O_pad), lambda i: (0, 0)),
            ],
            out_specs=pl.BlockSpec((TB, O_pad), lambda i: (i, 0)),
        ),
        compiler_params=pltpu.CompilerParams(
            dimension_semantics=("parallel",),   # lets v7x's 2 TCs split the batch
        ),
    )(x_in, w_padded, b_padded)

    return out_padded[:B, :out_dim]


if __name__ == "__main__":
    key = jax.random.PRNGKey(0)
    k_x, k_w, k_b = jax.random.split(key, 3)

    # Small, deterministic multi-hot batch (~5% active vocabulary entries),
    # matching the encoded_skipped -> float32 tensor in the reference module.
    batch = 64
    x = (jax.random.uniform(k_x, (batch, VOCAB)) < 0.05).astype(jnp.float32)

    # Deterministic parameter init mirroring nn.Linear(len(vocabulary), 10):
    # U(-1/sqrt(fan_in), 1/sqrt(fan_in)); weight stored pre-transposed (V, 10).
    bound = 1.0 / jnp.sqrt(jnp.float32(VOCAB))
    w = jax.random.uniform(k_w, (VOCAB, OUT_DIM), minval=-bound, maxval=bound,
                           dtype=jnp.float32)
    b = jax.random.uniform(k_b, (OUT_DIM,), minval=-bound, maxval=bound,
                           dtype=jnp.float32)

    # Parameters are padded/cast once (not per forward call).
    w_p, b_p = prepare_params(w, b)

    out = embedding_layer_forward(x, w_p, b_p)
    out = jax.block_until_ready(out)

    # Correctness vs. plain f32 reference (tolerance covers the deliberate
    # bf16 weight cast; x is 0/1 so its bf16 path is exact, accum is f32).
    ref = x @ w + b
    assert out.shape == (batch, OUT_DIM)
    assert jnp.allclose(out, ref, atol=1e-2, rtol=1e-2)

    print("KERNEL_OK")
</pallas_src>

<mosaic_0001>
module attributes {stable_mosaic.version = 11 : i64} {
  func.func @linear_kernel(%arg0: i32, %arg1: memref<64x213xf32, #tpu.memory_space<vmem>>, %arg2: memref<213x128xbf16, #tpu.memory_space<vmem>>, %arg3: memref<1x128xf32, #tpu.memory_space<vmem>>, %arg4: memref<64x128xf32, #tpu.memory_space<vmem>>) attributes {dimension_semantics = [#tpu.dimension_semantics<parallel>], iteration_bounds = array<i64: 1>, scalar_prefetch = 0 : i64, scratch_operands = 0 : i64, tpu.core_type = #tpu.core_type<tc>, window_params = [{transform_indices = @transform_0, window_bounds = array<i64: 64, 213>}, {pipeline_mode = #tpu.pipeline_mode<synchronous>, transform_indices = @transform_1, window_bounds = array<i64: 213, 128>}, {pipeline_mode = #tpu.pipeline_mode<synchronous>, transform_indices = @transform_2, window_bounds = array<i64: 1, 128>}, {transform_indices = @transform_3, window_bounds = array<i64: 64, 128>}]} {
    %c0 = arith.constant 0 : index
    %c0_0 = arith.constant 0 : index
    %0 = vector.load %arg1[%c0, %c0_0] : memref<64x213xf32, #tpu.memory_space<vmem>>, vector<64x213xf32>
    %1 = arith.truncf %0 : vector<64x213xf32> to vector<64x213xbf16>
    %c0_1 = arith.constant 0 : index
    %c0_2 = arith.constant 0 : index
    %2 = vector.load %arg2[%c0_1, %c0_2] : memref<213x128xbf16, #tpu.memory_space<vmem>>, vector<213x128xbf16>
    %cst = arith.constant dense<0.000000e+00> : vector<64x128xf32>
    %3 = tpu.matmul %1, %2, %cst {dimension_numbers = #tpu.dot_dimension_numbers<[1], [0], [0], [1], [0, 0, 1, 1], [], []>} : vector<64x213xbf16>, vector<213x128xbf16>, vector<64x128xf32> -> vector<64x128xf32>
    %c0_3 = arith.constant 0 : index
    %c0_4 = arith.constant 0 : index
    %4 = vector.load %arg3[%c0_3, %c0_4] : memref<1x128xf32, #tpu.memory_space<vmem>>, vector<1x128xf32>
    %5 = vector.broadcast %4 : vector<1x128xf32> to vector<64x128xf32>
    %6 = arith.addf %3, %5 : vector<64x128xf32>
    %c0_5 = arith.constant 0 : index
    %c0_6 = arith.constant 0 : index
    %7 = vector.load %arg4[%c0_5, %c0_6] : memref<64x128xf32, #tpu.memory_space<vmem>>, vector<64x128xf32>
    tpu.vector_store %arg4[%c0_5, %c0_6], %6 {strides = array<i32>} : memref<64x128xf32, #tpu.memory_space<vmem>>, vector<64x128xf32>,
    return
  }
  func.func @transform_0(%arg0: i32) -> (i32, i32) {
    %c0_i32 = arith.constant 0 : i32
    %c0_i32_0 = arith.constant 0 : i32
    return %arg0, %c0_i32 : i32, i32
  }
  func.func @transform_1(%arg0: i32) -> (i32, i32) {
    %c0_i32 = arith.constant 0 : i32
    %c0_i32_0 = arith.constant 0 : i32
    %c0_i32_1 = arith.constant 0 : i32
    return %c0_i32, %c0_i32_0 : i32, i32
  }
  func.func @transform_2(%arg0: i32) -> (i32, i32) {
    %c0_i32 = arith.constant 0 : i32
    %c0_i32_0 = arith.constant 0 : i32
    %c0_i32_1 = arith.constant 0 : i32
    return %c0_i32, %c0_i32_0 : i32, i32
  }
  func.func @transform_3(%arg0: i32) -> (i32, i32) {
    %c0_i32 = arith.constant 0 : i32
    %c0_i32_0 = arith.constant 0 : i32
    return %arg0, %c0_i32 : i32, i32
  }
}

</mosaic_0001>

<bundles_post_ra>
// kernel: embedding_layer_forward.1
= control target key start
LH: loop header
LB: loop body
LE: loop exit
PB: predicated region body
PF: predicated region fallthrough
CT: control target
= control target key end

     0   :  { %8 = vsyncpa [#allocation3], 0  ;;  %s509_s0 = inlined_call_operand.hbm [shape: f32[64,213], index: 0, kind: input, shape index: {}]   ;;  %s510_s1 = inlined_call_operand.hbm [shape: bf16[213,128], index: 1, kind: input, shape index: {}]   ;;  %s511_s2 = inlined_call_operand.vmem [shape: f32[1,128], index: 2, kind: input, shape index: {}]   ;;  %s512_s3 = inlined_call_operand.vmem [shape: f32[64,128], index: 3, kind: output, shape index: {}]  }
   0x1   :  { %9 = vsyncpa [#allocation5], 0  ;;  %s398_s12 = smov [#allocation2]   ;;  %s350_s16 = scalar_lea.hbm %s509_s0, 2048 }
   0x2   :  { %s15_s13 = sshll.u32 %s398_s12, 4  ;;  %p351_p0 = scmp.ne.s32.totalorder %s509_s0, %s350_s16  ;;  %s16_s13 = int_to_ptr.vmem [resolvable:$true] %s15_s13 }
   0x3   :  { %p354_p1 = scmp.lt.u32.totalorder %s350_s16, %s509_s0 }
   0x5   :  { %p356_p2 = pnand %p354_p1, %p351_p0 }
   0x7   :  { %359 = shalt.err (!%p356_p2)
}
   0x8   :  { %s360_s21 = scalar_lea.vmem %s16_s13, 2048  ;;  %p365_p4 = scmp.lt.s32.totalorder %s16_s13, %s16_s13 }
   0x9   :  { %p361_p3 = scmp.ne.s32.totalorder %s16_s13, %s360_s21  ;;  %p366_p5 = scmp.lt.s32.totalorder %s360_s21, %s360_s21 }
   0xb   :  { %p367_p6 = por %p366_p5, %p365_p4 }
   0xd   :  { %p368_p7 = pnand %p367_p6, %p361_p3 }
   0xf   :  { %371 = shalt.err (!%p368_p7)
}
  0x10   :  { %s399_s22 = smov 256   ;;  %s400_s23 = smov 16  }
  0x11   :  { %21 = dma.hbm_to_vmem [thread:$0]  %s509_s0, 2048, %s16_s13, [#allocation3], %s399_s22, %s399_s22, %s400_s23  }
  0x12   :  { %s401_s26 = smov [#allocation4]   ;;  %s372_s30 = scalar_lea.hbm %s510_s1, 1728 }
  0x13   :  { %s27_s27 = sshll.u32 %s401_s26, 4  ;;  %p373_p8 = scmp.ne.s32.totalorder %s510_s1, %s372_s30  ;;  %s28_s27 = int_to_ptr.vmem [resolvable:$true] %s27_s27 }
  0x14   :  { %p376_p9 = scmp.lt.u32.totalorder %s372_s30, %s510_s1 }
  0x16   :  { %p378_p10 = pnand %p376_p9, %p373_p8 }
  0x18   :  { %381 = shalt.err (!%p378_p10)
}
  0x19   :  { %s382_s8 = scalar_lea.vmem %s28_s27, 1728  ;;  %p387_p12 = scmp.lt.s32.totalorder %s28_s27, %s28_s27 }
  0x1a   :  { %p383_p11 = scmp.ne.s32.totalorder %s28_s27, %s382_s8  ;;  %p388_p13 = scmp.lt.s32.totalorder %s382_s8, %s382_s8 }
  0x1c   :  { %p389_p0 = por %p388_p13, %p387_p12 }
  0x1e   :  { %p390_p1 = pnand %p389_p0, %p383_p11 }
  0x20   :  { %393 = shalt.err (!%p390_p1)
}
  0x21   :  { %s402_s0 = smov 64   ;;  %s403_s9 = smov 4  }
  0x22   :  { %33 = dma.hbm_to_vmem [thread:$0]  %s510_s1, 1728, %s28_s27, [#allocation5], %s402_s0, %s402_s0, %s403_s9  }
  0x23   :  { %394 = dma.done.wait [#allocation3], 2048  }
  0x24   :  { %395 = vsyncadd [#allocation3], 4294965248 }
  0x25   :  { %396 = dma.done.wait [#allocation5], 1728  }
  0x26   :  { %397 = vsyncadd [#allocation5], 4294965568  ;;  %v404_v0 = vmov 0   ;;  %v336_v1 = vld [vmem:[#allocation4] sm:$0xff]   ;;  %v337_v2 = vld [vmem:[#allocation4 + $0x8] sm:$0xff]   ;;  %vm182_vm0 = vcmask 695296  }
  0x27   :  { %202 = vmatprep.subr.bf16.mxu0 %v404_v0  ;;  %300 = vmatprep.subr.bf16.mxu1 %v404_v0  ;;  %v338_v3 = vld [vmem:[#allocation4 + $0x10] sm:$0xff]   ;;  %v339_v4 = vld [vmem:[#allocation4 + $0x18] sm:$0xff]   ;;  %v340_v5 = vld [vmem:[#allocation4 + $0x20] sm:$0xff]   ;;  %vm195_vm1 = vcmask 1041408   ;;  %vm196_vm2 = vcmask 1042432   ;;  %v405_v19 = vmov 65535  }
  0x28   :  { %203 = vmatpush1.bf16.msra.mxu0 %v336_v1  ;;  %314 = vmatpush1.bf16.msra.mxu1 %v336_v1  ;;  %v44_v6 = vld [vmem:[#allocation2 + $0x8] sm:$0xff]  ;;  %v46_v7 = vld [vmem:[#allocation2 + $0x18] sm:$0xff]  ;;  %v342_v13 = vld [vmem:[#allocation4 + $0x30] sm:$0xff]   ;;  %v197_v20 = vsel %vm195_vm1, 4294967295, %v405_v19 }
  0x29   :  { %204 = vmatprep.subr.bf16.mxu0 %v404_v0  ;;  %301 = vmatprep.subr.bf16.mxu1 %v404_v0  ;;  %v52_v8 = vld [vmem:[#allocation2 + $0x48] sm:$0xff]  ;;  %v54_v9 = vld [vmem:[#allocation2 + $0x58] sm:$0xff]  ;;  %v60_v10 = vpack.c.bf16 %v46_v7, %v44_v6  ;;  %v344_v15 = vld [vmem:[#allocation4 + $0x40] sm:$0xff]   ;;  %v198_v23 = vsel %vm196_vm2, %v197_v20, 0 }
  0x2a   :  { %v64_v11 = vpack.c.bf16 %v54_v9, %v52_v8  ;;  %v341_v12 = vld [vmem:[#allocation4 + $0x28] sm:$0xff]   ;;  %v343_v14 = vld [vmem:[#allocation4 + $0x38] sm:$0xff]   ;;  %v346_v17 = vld [vmem:[#allocation4 + $0x50] sm:$0xff]  }
  0x2b   :  { %296 = vmatprep.mubr.msk.bf16.mxu0 %vm182_vm0, %v60_v10  ;;  %v345_v16 = vld [vmem:[#allocation4 + $0x48] sm:$0xff]   ;;  %v347_v18 = vld [vmem:[#allocation4 + $0x58] sm:$0xff]   ;;  %v348_v21 = vld [vmem:[#allocation4 + $0x60] sm:$0xff]  }
  0x2c   :  { %205 = vmatpush1.bf16.msra.mxu0 %v337_v2  ;;  %315 = vmatpush1.bf16.msra.mxu1 %v337_v2  ;;  %v349_v22 = vld [vmem:[#allocation4 + $0x68] ss:$0 sps:$4 sm:$0x77]   ;;  %v43_v24 = vld [vmem:[#allocation2] sm:$0xff]  ;;  %v45_v25 = vld [vmem:[#allocation2 + $0x10] sm:$0xff] }
  0x2d   :  { %206 = vmatprep.subr.bf16.mxu0 %v404_v0  ;;  %302 = vmatprep.subr.bf16.mxu1 %v404_v0  ;;  %v200_v26 = vand.u32 %v349_v22, %v198_v23  ;;  %v51_v27 = vld [vmem:[#allocation2 + $0x40] sm:$0xff]  ;;  %v53_v28 = vld [vmem:[#allocation2 + $0x50] sm:$0xff]  ;;  %v48_v29 = vld [vmem:[#allocation2 + $0x28] sm:$0xff]  ;;  %v59_v33 = vpack.c.bf16 %v45_v25, %v43_v24 }
  0x2e   :  { %298 = vmatprep.mubr.msk.bf16.mxu1 %vm182_vm0, %v64_v11  ;;  %v50_v30 = vld [vmem:[#allocation2 + $0x38] sm:$0xff]  ;;  %v56_v31 = vld [vmem:[#allocation2 + $0x68] sm:$0xff]  ;;  %v63_v34 = vpack.c.bf16 %v53_v28, %v51_v27  ;;  %v47_v37 = vld [vmem:[#allocation2 + $0x20] sm:$0xff] }
  0x2f   :  { %v58_v32 = vld [vmem:[#allocation2 + $0x78] sm:$0xff]  ;;  %v62_v35 = vpack.c.bf16 %v50_v30, %v48_v29  ;;  %v49_v38 = vld [vmem:[#allocation2 + $0x30] sm:$0xff]  ;;  %v55_v39 = vld [vmem:[#allocation2 + $0x60] sm:$0xff] }
  0x30   :  { %207 = vmatpush1.bf16.msra.mxu0 %v338_v3  ;;  %316 = vmatpush1.bf16.msra.mxu1 %v338_v3  ;;  %v66_v36 = vpack.c.bf16 %v58_v32, %v56_v31  ;;  %v57_v40 = vld [vmem:[#allocation2 + $0x70] sm:$0xff]  ;;  %v61_v41 = vpack.c.bf16 %v49_v38, %v47_v37  ;;  %v281_v43 = vld [vmem:[%s511_s2] ss:$0 sm:$0xff] }
  0x31   :  { %208 = vmatprep.subr.bf16.mxu0 %v404_v0  ;;  %303 = vmatprep.subr.bf16.mxu1 %v404_v0  ;;  %v65_v42 = vpack.c.bf16 %v57_v40, %v55_v39 }
  0x34   :  { %209 = vmatpush1.bf16.msra.mxu0 %v339_v4  ;;  %317 = vmatpush1.bf16.msra.mxu1 %v339_v4 }
  0x35   :  { %210 = vmatprep.subr.bf16.mxu0 %v404_v0  ;;  %304 = vmatprep.subr.bf16.mxu1 %v404_v0 }
  0x38   :  { %211 = vmatpush1.bf16.msra.mxu0 %v340_v5  ;;  %318 = vmatpush1.bf16.msra.mxu1 %v340_v5 }
  0x39   :  { %212 = vmatprep.subr.bf16.mxu0 %v404_v0  ;;  %305 = vmatprep.subr.bf16.mxu1 %v404_v0 }
  0x3c   :  { %213 = vmatpush1.bf16.msra.mxu0 %v341_v12  ;;  %319 = vmatpush1.bf16.msra.mxu1 %v341_v12 }
  0x3d   :  { %214 = vmatprep.subr.bf16.mxu0 %v404_v0  ;;  %306 = vmatprep.subr.bf16.mxu1 %v404_v0 }
  0x40   :  { %215 = vmatpush1.bf16.msra.mxu0 %v342_v13  ;;  %320 = vmatpush1.bf16.msra.mxu1 %v342_v13 }
  0x41   :  { %216 = vmatprep.subr.bf16.mxu0 %v404_v0  ;;  %307 = vmatprep.subr.bf16.mxu1 %v404_v0 }
  0x44   :  { %217 = vmatpush1.bf16.msra.mxu0 %v343_v14  ;;  %321 = vmatpush1.bf16.msra.mxu1 %v343_v14 }
  0x45   :  { %218 = vmatprep.subr.bf16.mxu0 %v404_v0  ;;  %308 = vmatprep.subr.bf16.mxu1 %v404_v0 }
  0x48   :  { %219 = vmatpush1.bf16.msra.mxu0 %v344_v15  ;;  %322 = vmatpush1.bf16.msra.mxu1 %v344_v15 }
  0x49   :  { %220 = vmatprep.subr.bf16.mxu0 %v404_v0  ;;  %309 = vmatprep.subr.bf16.mxu1 %v404_v0 }
  0x4c   :  { %221 = vmatpush1.bf16.msra.mxu0 %v345_v16  ;;  %323 = vmatpush1.bf16.msra.mxu1 %v345_v16 }
  0x4d   :  { %222 = vmatprep.subr.bf16.mxu0 %v404_v0  ;;  %310 = vmatprep.subr.bf16.mxu1 %v404_v0 }
  0x50   :  { %223 = vmatpush1.bf16.msra.mxu0 %v346_v17  ;;  %324 = vmatpush1.bf16.msra.mxu1 %v346_v17 }
  0x51   :  { %224 = vmatprep.subr.bf16.mxu0 %v404_v0  ;;  %311 = vmatprep.subr.bf16.mxu1 %v404_v0 }
  0x54   :  { %225 = vmatpush1.bf16.msra.mxu0 %v347_v18  ;;  %325 = vmatpush1.bf16.msra.mxu1 %v347_v18 }
  0x55   :  { %226 = vmatprep.subr.bf16.mxu0 %v404_v0  ;;  %312 = vmatprep.subr.bf16.mxu1 %v404_v0 }
  0x58   :  { %227 = vmatpush1.bf16.msra.mxu0 %v348_v21  ;;  %326 = vmatpush1.bf16.msra.mxu1 %v348_v21 }
  0x59   :  { %228 = vmatprep.subr.bf16.mxu0 %v404_v0  ;;  %313 = vmatprep.subr.bf16.mxu1 %v404_v0 }
  0x5c   :  { %229 = vmatpush1.bf16.msra.mxu0 %v200_v26  ;;  %327 = vmatpush1.bf16.msra.mxu1 %v200_v26 }
  0x5f   :  { %235 = vmatmul.mubr.bf16.vlgmr.msra.gmra.mrb[0].mxu0 %v59_v33  ;;  %251 = vmatmul.mubr.bf16.vlgmr.msra.gmra.mrb[0].mxu1 %v63_v34 }
  0x60   :  { %297 = vmatprep.mubr.msk.bf16.mxu0 %vm182_vm0, %v62_v35  ;;  %299 = vmatprep.mubr.msk.bf16.mxu1 %vm182_vm0, %v66_v36 }
  0x67   :  { %243 = vmatmul.mubr.bf16.gmra.mrb[4].mxu0 %v61_v41  ;;  %259 = vmatmul.mubr.bf16.gmra.mrb[4].mxu1 %v65_v42 }
 0x132   :  { %v236_v44 = vpop.f32.mrb[0].mxu0  ;;  %v252_v45 = vpop.f32.mrb[0].mxu1 }
 0x133   :  { %v237_v46 = vadd.f32 %v281_v43, %v236_v44  ;;  %v253_v47 = vadd.f32 %v281_v43, %v252_v45  ;;  %v238_v48 = vpop.f32.mrb[1].mxu0  ;;  %v254_v49 = vpop.f32.mrb[1].mxu1 }
 0x134   :  { %v239_v50 = vpop.f32.mrb[2].mxu0  ;;  %v255_v51 = vpop.f32.mrb[2].mxu1 }
 0x135   :  { %267 = vst [vmem:[%s512_s3] sm:$0xff] %v237_v46  ;;  %271 = vst [vmem:[%s512_s3 + $0x20] sm:$0xff] %v253_v47  ;;  %v240_v52 = vadd.f32 %v281_v43, %v239_v50  ;;  %v256_v53 = vadd.f32 %v281_v43, %v255_v51  ;;  %v241_v54 = vpop.f32.mrb[3].mxu0  ;;  %v257_v55 = vpop.f32.mrb[3].mxu1 }
 0x137   :  { %268 = vst [vmem:[%s512_s3 + $0x8] sm:$0xff] %v240_v52  ;;  %272 = vst [vmem:[%s512_s3 + $0x28] sm:$0xff] %v256_v53 }
 0x13a   :  { %v244_v56 = vpop.f32.mrb[4].mxu0  ;;  %v260_v57 = vpop.f32.mrb[4].mxu1 }
 0x13b   :  { %v245_v58 = vadd.f32 %v281_v43, %v244_v56  ;;  %v261_v59 = vadd.f32 %v281_v43, %v260_v57  ;;  %v246_v60 = vpop.f32.mrb[5].mxu0  ;;  %v262_v61 = vpop.f32.mrb[5].mxu1 }
 0x13c   :  { %v247_v62 = vpop.f32.mrb[6].mxu0  ;;  %v263_v63 = vpop.f32.mrb[6].mxu1 }
 0x13d   :  { %269 = vst [vmem:[%s512_s3 + $0x10] sm:$0xff] %v245_v58  ;;  %273 = vst [vmem:[%s512_s3 + $0x30] sm:$0xff] %v261_v59  ;;  %v248_v0 = vadd.f32 %v281_v43, %v247_v62  ;;  %v264_v1 = vadd.f32 %v281_v43, %v263_v63  ;;  %v249_v2 = vpop.f32.mrb[7].mxu0  ;;  %v265_v3 = vpop.f32.mrb[7].mxu1 }
 0x13f   :  { %270 = vst [vmem:[%s512_s3 + $0x18] sm:$0xff] %v248_v0  ;;  %274 = vst [vmem:[%s512_s3 + $0x38] sm:$0xff] %v264_v1 }
 0x140   :  { %279 = vsyncpa [#allocation3], 1 }
 0x141   :  { %280 = vsyncpa [#allocation5], 1 }

</bundles_post_ra>
